<compile_context>
chip_gen: v7x
topology: tpu7x:2x2x1
jax: 0.10.0
libtpu: 0.0.40
codegen_flags: <defaults>
</compile_context>

<pallas_src>
import jax
import jax.numpy as jnp
from jax.experimental import pallas as pl
from jax.experimental.pallas import tpu as pltpu

LN_EPS = 1e-5  # torch.nn.LayerNorm default


def _classifier_kernel(x_ref, w1_ref, b1_ref, w2_ref, b2_ref, o_ref):
    # Whole hot path (layernorm core, two matmuls, relu) runs inside the kernel.
    x = x_ref[...].astype(jnp.float32)                        # (TB, D)

    # Single-pass LayerNorm statistics over the last dim (biased variance, torch semantics).
    mean = jnp.mean(x, axis=-1, keepdims=True)
    mean_sq = jnp.mean(x * x, axis=-1, keepdims=True)
    var = jnp.maximum(mean_sq - mean * mean, 0.0)             # clamp: guards cancellation
    xn = (x - mean) * jax.lax.rsqrt(var + LN_EPS)             # (TB, D); affine folded into w1/b1

    # fc1 (LN affine folded in) + ReLU.  bf16 MXU feed, f32 accumulation.
    h = jnp.dot(xn.astype(jnp.bfloat16), w1_ref[...],
                preferred_element_type=jnp.float32) + b1_ref[...]
    h = jnp.maximum(h, 0.0)                                   # (TB, H_pad)

    # fc2 straight to the 3 real classes (no lane padding on the output).
    out = jnp.dot(h.astype(jnp.bfloat16), w2_ref[...],
                  preferred_element_type=jnp.float32) + b2_ref[...]
    o_ref[...] = out.astype(o_ref.dtype)                      # (TB, C)


def _round_up(n, m):
    return ((n + m - 1) // m) * m


def _choose_tile_b(B, D, itemsize):
    """Pick a batch tile: ~1 MiB x-tiles (HBM-roofline knee), multiple of 32 sublanes,
    shrunk so small batches still produce a multi-step grid (v7x megacore / pipelining)."""
    row_bytes = max(D * itemsize, 1)
    tb = _round_up((1 << 20) // row_bytes, 32)
    tb = max(32, min(tb, 8192))
    b32 = _round_up(B, 32)
    tb = min(tb, b32)
    if b32 // tb < 8:                     # prefer >= 8 grid steps when the batch allows it
        tb = max(32, _round_up(pl.cdiv(b32, 8), 32))
    return tb


def final_classifier(x, gamma, beta, w1, b1, w2, b2, *, tile_b=None):
    """x: (B, D); gamma/beta: (D,) or (1,D); w1: (D,H); b1: (H,); w2: (H,C); b2: (C,)."""
    B, D = x.shape
    H = w1.shape[1]       # 60
    C = w2.shape[1]       # 3

    # ---- wrapper-side parameter prep (tiny, runs once per call) -------------------------
    gamma = jnp.asarray(gamma, jnp.float32).reshape(D)
    beta = jnp.asarray(beta, jnp.float32).reshape(D)
    w1 = jnp.asarray(w1, jnp.float32)
    b1 = jnp.asarray(b1, jnp.float32).reshape(H)
    w2 = jnp.asarray(w2, jnp.float32)
    b2 = jnp.asarray(b2, jnp.float32).reshape(C)

    # Fold LayerNorm affine into fc1:  (xn*g + b) @ w1 + b1 == xn @ (g[:,None]*w1) + (b@w1 + b1)
    w1_eff = gamma[:, None] * w1
    b1_eff = b1 + beta @ w1

    # Zero-pad the hidden dim to 128 lanes (dense intermediate); keep the class dim at C=3 and
    # store weights in bf16 (MXU native, half the HBM read / VMEM footprint).
    H_pad = _round_up(max(H, 128), 128)
    w1_p = jnp.zeros((D, H_pad), jnp.bfloat16).at[:, :H].set(w1_eff.astype(jnp.bfloat16))
    b1_p = jnp.zeros((1, H_pad), jnp.float32).at[:, :H].set(b1_eff)
    w2_p = jnp.zeros((H_pad, C), jnp.bfloat16).at[:H, :].set(w2.astype(jnp.bfloat16))
    b2_p = b2.reshape(1, C)

    # ---- batch tiling: multi-step grid -> DMA/compute pipelining & megacore sharding ----
    if tile_b is None:
        tile_b = _choose_tile_b(B, D, jnp.dtype(x.dtype).itemsize)
    assert tile_b % 32 == 0, "tile_b must be a multiple of 32 (f32/bf16 sublane packing)"
    B_pad = _round_up(B, tile_b)
    if B_pad != B:
        x = jnp.pad(x, ((0, B_pad - B), (0, 0)))   # padded rows are harmless and discarded
    grid = (B_pad // tile_b,)

    out = pl.pallas_call(
        _classifier_kernel,
        out_shape=jax.ShapeDtypeStruct((B_pad, C), x.dtype),   # torch preserves input dtype
        grid_spec=pltpu.PrefetchScalarGridSpec(
            num_scalar_prefetch=0,
            grid=grid,
            in_specs=[
                pl.BlockSpec((tile_b, D), lambda i: (i, 0)),       # x tile (pipelined)
                pl.BlockSpec((D, H_pad), lambda i: (0, 0)),        # w1' bf16 (grid-invariant)
                pl.BlockSpec((1, H_pad), lambda i: (0, 0)),        # b1' f32
                pl.BlockSpec((H_pad, C), lambda i: (0, 0)),        # w2 bf16 (C == full dim)
                pl.BlockSpec((1, C), lambda i: (0, 0)),            # b2 f32
            ],
            out_specs=pl.BlockSpec((tile_b, C), lambda i: (i, 0)),  # (tile_b, 3): tiny writeback
        ),
        compiler_params=pltpu.CompilerParams(
            dimension_semantics=("parallel",),
            vmem_limit_bytes=32 * 1024 * 1024,   # v5e scoped default is 16 MiB; be explicit
        ),
    )(x, w1_p, b1_p, w2_p, b2_p)

    # Only the batch padding (if any) is sliced off; no lane padding on the class dim.
    return out if B_pad == B else out[:B]


def reference(x, gamma, beta, w1, b1, w2, b2):
    x = x.astype(jnp.float32)
    mean = jnp.mean(x, axis=-1, keepdims=True)
    var = jnp.mean((x - mean) ** 2, axis=-1, keepdims=True)
    xn = (x - mean) / jnp.sqrt(var + LN_EPS) * gamma.reshape(1, -1) + beta.reshape(1, -1)
    h = jnp.maximum(xn @ w1 + b1.reshape(1, -1), 0.0)
    return h @ w2 + b2.reshape(1, -1)


if __name__ == "__main__":
    key = jax.random.PRNGKey(0)
    B, D, H, C = 64, 32, 60, 3   # small shapes; auto tile_b=32 -> 2-step grid

    kx, kw1, kb1, kw2, kb2, kg, kb = jax.random.split(key, 7)
    x = jax.random.normal(kx, (B, D), dtype=jnp.float32)

    # Deterministic synthetic parameters (shapes consistent with the torch module,
    # Linear weights stored transposed: [in_features, out_features]).
    w1 = jax.random.normal(kw1, (D, H), dtype=jnp.float32) * (1.0 / jnp.sqrt(D))
    b1 = jax.random.normal(kb1, (H,), dtype=jnp.float32) * 0.01
    w2 = jax.random.normal(kw2, (H, C), dtype=jnp.float32) * (1.0 / jnp.sqrt(H))
    b2 = jax.random.normal(kb2, (C,), dtype=jnp.float32) * 0.01
    gamma = 1.0 + 0.1 * jax.random.normal(kg, (D,), dtype=jnp.float32)
    beta = 0.1 * jax.random.normal(kb, (D,), dtype=jnp.float32)

    out = final_classifier(x, gamma, beta, w1, b1, w2, b2)
    out = jax.block_until_ready(out)

    ref = reference(x, gamma, beta, w1, b1, w2, b2)
    assert out.shape == (B, C), out.shape
    # bf16 MXU feed -> allow bf16-level tolerance vs the f32 reference.
    assert jnp.max(jnp.abs(out - ref)) < 3e-2, "mismatch vs reference"

    print("KERNEL_OK")
</pallas_src>

<mosaic_0001>
module attributes {stable_mosaic.version = 11 : i64} {
  func.func @_classifier_kernel(%arg0: i32, %arg1: memref<32x32xf32, #tpu.memory_space<vmem>>, %arg2: memref<32x128xbf16, #tpu.memory_space<vmem>>, %arg3: memref<1x128xf32, #tpu.memory_space<vmem>>, %arg4: memref<128x3xbf16, #tpu.memory_space<vmem>>, %arg5: memref<1x3xf32, #tpu.memory_space<vmem>>, %arg6: memref<32x3xf32, #tpu.memory_space<vmem>>) attributes {dimension_semantics = [#tpu.dimension_semantics<parallel>], iteration_bounds = array<i64: 2>, scalar_prefetch = 0 : i64, scratch_operands = 0 : i64, tpu.core_type = #tpu.core_type<tc>, window_params = [{transform_indices = @transform_0, window_bounds = array<i64: 32, 32>}, {pipeline_mode = #tpu.pipeline_mode<synchronous>, transform_indices = @transform_1, window_bounds = array<i64: 32, 128>}, {pipeline_mode = #tpu.pipeline_mode<synchronous>, transform_indices = @transform_2, window_bounds = array<i64: 1, 128>}, {pipeline_mode = #tpu.pipeline_mode<synchronous>, transform_indices = @transform_3, window_bounds = array<i64: 128, 3>}, {pipeline_mode = #tpu.pipeline_mode<synchronous>, transform_indices = @transform_4, window_bounds = array<i64: 1, 3>}, {transform_indices = @transform_5, window_bounds = array<i64: 32, 3>}]} {
    %c0 = arith.constant 0 : index
    %c0_0 = arith.constant 0 : index
    %0 = vector.load %arg1[%c0, %c0_0] : memref<32x32xf32, #tpu.memory_space<vmem>>, vector<32x32xf32>
    %cst = arith.constant dense<0.000000e+00> : vector<32xf32>
    %1 = vector.multi_reduction <add>, %0, %cst [1] : vector<32x32xf32> to vector<32xf32>
    %2 = vector.shape_cast %1 : vector<32xf32> to vector<32x1xf32>
    %cst_1 = arith.constant 3.200000e+01 : f32
    %3 = vector.broadcast %cst_1 : f32 to vector<32x1xf32>
    %4 = arith.divf %2, %3 : vector<32x1xf32>
    %5 = arith.mulf %0, %0 : vector<32x32xf32>
    %cst_2 = arith.constant dense<0.000000e+00> : vector<32xf32>
    %6 = vector.multi_reduction <add>, %5, %cst_2 [1] : vector<32x32xf32> to vector<32xf32>
    %7 = vector.shape_cast %6 : vector<32xf32> to vector<32x1xf32>
    %cst_3 = arith.constant 3.200000e+01 : f32
    %8 = vector.broadcast %cst_3 : f32 to vector<32x1xf32>
    %9 = arith.divf %7, %8 : vector<32x1xf32>
    %10 = arith.mulf %4, %4 : vector<32x1xf32>
    %11 = arith.subf %9, %10 : vector<32x1xf32>
    %cst_4 = arith.constant 0.000000e+00 : f32
    %12 = vector.broadcast %cst_4 : f32 to vector<32x1xf32>
    %13 = arith.maximumf %11, %12 : vector<32x1xf32>
    %14 = vector.broadcast %4 : vector<32x1xf32> to vector<32x32xf32>
    %15 = arith.subf %0, %14 : vector<32x32xf32>
    %cst_5 = arith.constant 9.99999974E-6 : f32
    %16 = vector.broadcast %cst_5 : f32 to vector<32x1xf32>
    %17 = arith.addf %13, %16 : vector<32x1xf32>
    %18 = math.rsqrt %17 : vector<32x1xf32>
    %19 = vector.broadcast %18 : vector<32x1xf32> to vector<32x32xf32>
    %20 = arith.mulf %15, %19 : vector<32x32xf32>
    %21 = arith.truncf %20 : vector<32x32xf32> to vector<32x32xbf16>
    %c0_6 = arith.constant 0 : index
    %c0_7 = arith.constant 0 : index
    %22 = vector.load %arg2[%c0_6, %c0_7] : memref<32x128xbf16, #tpu.memory_space<vmem>>, vector<32x128xbf16>
    %cst_8 = arith.constant dense<0.000000e+00> : vector<32x128xf32>
    %23 = tpu.matmul %21, %22, %cst_8 {dimension_numbers = #tpu.dot_dimension_numbers<[1], [0], [0], [1], [0, 0, 1, 1], [], []>} : vector<32x32xbf16>, vector<32x128xbf16>, vector<32x128xf32> -> vector<32x128xf32>
    %c0_9 = arith.constant 0 : index
    %c0_10 = arith.constant 0 : index
    %24 = vector.load %arg3[%c0_9, %c0_10] : memref<1x128xf32, #tpu.memory_space<vmem>>, vector<1x128xf32>
    %25 = vector.broadcast %24 : vector<1x128xf32> to vector<32x128xf32>
    %26 = arith.addf %23, %25 : vector<32x128xf32>
    %cst_11 = arith.constant 0.000000e+00 : f32
    %27 = vector.broadcast %cst_11 : f32 to vector<32x128xf32>
    %28 = arith.maximumf %26, %27 : vector<32x128xf32>
    %29 = arith.truncf %28 : vector<32x128xf32> to vector<32x128xbf16>
    %c0_12 = arith.constant 0 : index
    %c0_13 = arith.constant 0 : index
    %30 = vector.load %arg4[%c0_12, %c0_13] : memref<128x3xbf16, #tpu.memory_space<vmem>>, vector<128x3xbf16>
    %cst_14 = arith.constant dense<0.000000e+00> : vector<32x3xf32>
    %31 = tpu.matmul %29, %30, %cst_14 {dimension_numbers = #tpu.dot_dimension_numbers<[1], [0], [0], [1], [0, 0, 1, 1], [], []>} : vector<32x128xbf16>, vector<128x3xbf16>, vector<32x3xf32> -> vector<32x3xf32>
    %c0_15 = arith.constant 0 : index
    %c0_16 = arith.constant 0 : index
    %32 = vector.load %arg5[%c0_15, %c0_16] : memref<1x3xf32, #tpu.memory_space<vmem>>, vector<1x3xf32>
    %33 = vector.broadcast %32 : vector<1x3xf32> to vector<32x3xf32>
    %34 = arith.addf %31, %33 : vector<32x3xf32>
    %c0_17 = arith.constant 0 : index
    %c0_18 = arith.constant 0 : index
    %35 = vector.load %arg6[%c0_17, %c0_18] : memref<32x3xf32, #tpu.memory_space<vmem>>, vector<32x3xf32>
    tpu.vector_store %arg6[%c0_17, %c0_18], %34 {strides = array<i32>} : memref<32x3xf32, #tpu.memory_space<vmem>>, vector<32x3xf32>,
    return
  }
  func.func @transform_0(%arg0: i32) -> (i32, i32) {
    %c0_i32 = arith.constant 0 : i32
    %c0_i32_0 = arith.constant 0 : i32
    return %arg0, %c0_i32 : i32, i32
  }
  func.func @transform_1(%arg0: i32) -> (i32, i32) {
    %c0_i32 = arith.constant 0 : i32
    %c0_i32_0 = arith.constant 0 : i32
    %c0_i32_1 = arith.constant 0 : i32
    return %c0_i32, %c0_i32_0 : i32, i32
  }
  func.func @transform_2(%arg0: i32) -> (i32, i32) {
    %c0_i32 = arith.constant 0 : i32
    %c0_i32_0 = arith.constant 0 : i32
    %c0_i32_1 = arith.constant 0 : i32
    return %c0_i32, %c0_i32_0 : i32, i32
  }
  func.func @transform_3(%arg0: i32) -> (i32, i32) {
    %c0_i32 = arith.constant 0 : i32
    %c0_i32_0 = arith.constant 0 : i32
    %c0_i32_1 = arith.constant 0 : i32
    return %c0_i32, %c0_i32_0 : i32, i32
  }
  func.func @transform_4(%arg0: i32) -> (i32, i32) {
    %c0_i32 = arith.constant 0 : i32
    %c0_i32_0 = arith.constant 0 : i32
    %c0_i32_1 = arith.constant 0 : i32
    return %c0_i32, %c0_i32_0 : i32, i32
  }
  func.func @transform_5(%arg0: i32) -> (i32, i32) {
    %c0_i32 = arith.constant 0 : i32
    %c0_i32_0 = arith.constant 0 : i32
    return %arg0, %c0_i32 : i32, i32
  }
}

</mosaic_0001>

<bundles_post_ra>
// kernel: tpu_custom_call.1
= control target key start
LH: loop header
LB: loop body
LE: loop exit
PB: predicated region body
PF: predicated region fallthrough
CT: control target
= control target key end

     0   :  { %s697_s18 = smov 0   ;;  %s791_s0 = inlined_call_operand.vmem [shape: f32[64,32], index: 0, kind: input, shape index: {}]   ;;  %s792_s1 = inlined_call_operand.vmem [shape: bf16[32,128], index: 1, kind: input, shape index: {}]   ;;  %s793_s2 = inlined_call_operand.vmem [shape: f32[1,128], index: 2, kind: input, shape index: {}]   ;;  %s794_s3 = inlined_call_operand.vmem [shape: bf16[128,3], index: 3, kind: input, shape index: {}]   ;;  %s795_s4 = inlined_call_operand.vmem [shape: f32[1,3], index: 4, kind: input, shape index: {}]   ;;  %s796_s5 = inlined_call_operand.vmem [shape: f32[64,3], index: 5, kind: output, shape index: {}]  }
   0x1 LB: > { %s566_s19 = sadd.s32 4294967295, %s665_s18   ;;  %p570_p0 = scmp.ge.s32.totalorder %s665_s18, 1  ;;  %s665_s18 = sphi %s697_s18, %s15_s18  }
   0x2   : > { %p188_p1 = scmp.lt.s32.totalorder %s665_s18, 3 }
   0x4   : > { %p189_p2 = pnand %p570_p0, %p188_p1 }
   0x5   : > { %s571_s20 = sshll.u32 (!%p189_p2), %s566_s19, 2  ;;  %vm233_vm0 = vcmask (!%p189_p2), 261120   ;;  %v641_v16 = vld [vmem:[%s792_s1] sm:$0xff] (!%p189_p2)   ;;  %v642_v17 = vld [vmem:[%s792_s1 + $0x8] sm:$0xff] (!%p189_p2)   ;;  %v645_v20 = vld [vmem:[%s794_s3 + $0x10] sm:$0xff] (!%p189_p2)   ;;  %vm505_vm1 = vcmask (!%p189_p2), 23552  }
   0x6   : > { %192 = sbr.rel (%p189_p2) target bundleno = 636 (0x27c), region = 40  ;;  %p217_p3 = scmp.lt.s32.totalorder (!%p189_p2), %s571_s20, 7  ;;  %605 = vmatprep.subr.bf16.mxu0 (!%p189_p2), %v641_v16  ;;  %v643_v18 = vld [vmem:[%s794_s3] sm:$0xff] (!%p189_p2)   ;;  %v644_v19 = vld [vmem:[%s794_s3 + $0x8] sm:$0xff] (!%p189_p2)   ;;  %v646_v21 = vld [vmem:[%s794_s3 + $0x18] sm:$0xff] (!%p189_p2)  }
   0x7   : > { %606 = vmatpush3.bf16.msra.mxu0 (!%p189_p2), %v641_v16  ;;  %613 = vmatprep.subr.bf16.mxu1 (!%p189_p2), %v643_v18  ;;  %v647_v22 = vld [vmem:[%s794_s3 + $0x20] sm:$0xff] (!%p189_p2)   ;;  %v648_v23 = vld [vmem:[%s794_s3 + $0x28] sm:$0xff] (!%p189_p2)  }
   0x8   : > { %607 = vmatprep.subr.bf16.mxu0 (!%p189_p2), %v642_v17  ;;  %614 = vmatpush3.bf16.msra.mxu1 (!%p189_p2), %v643_v18 }
   0x9   : > { %615 = vmatprep.subr.bf16.mxu1 (!%p189_p2), %v644_v19 }
   0xb   : > { %608 = vmatpush3.bf16.msra.mxu0 (!%p189_p2), %v642_v17 }
   0xc   : > { %616 = vmatpush3.bf16.msra.mxu1 (!%p189_p2), %v644_v19 }
   0xd   : > { %s798_s20 = smov (!%p217_p3, %s571_s20), 7  ;;  %617 = vmatprep.subr.bf16.mxu1 %v645_v20 }
   0xe   : > { %s572_s21 = sshll.u32 %s798_s20, 3 }
   0xf   : > { %s220_s24 = scalar_lea.vmem %s791_s0, %s572_s21  ;;  %s226_s29 = scalar_lea.vmem %s796_s5, %s572_s21 }
  0x10   : > { %v713_v0 = vld [vmem:[%s220_s24 + $0x10] sm:$0xff]  ;;  %v715_v1 = vld [vmem:[%s220_s24] sm:$0xff]  ;;  %v717_v2 = vld [vmem:[%s220_s24 + $0x18] sm:$0xff]  ;;  %618 = vmatpush3.bf16.msra.mxu1 %v645_v20 }
  0x11   : > { %v240_v3 = vsel %vm233_vm0, %v713_v0, 0.0  ;;  %v234_v4 = vsel %vm233_vm0, %v715_v1, 0.0  ;;  %v723_v5 = vld [vmem:[%s220_s24 + $0x8] sm:$0xff]  ;;  %v243_v6 = vsel %vm233_vm0, %v717_v2, 0.0  ;;  %v251_v9 = vmul.f32 %v715_v1, %v715_v1  ;;  %619 = vmatprep.subr.bf16.mxu1 %v646_v21 }
  0x12   : > { %241 = vadd.xlane.f32.xlu1 %v240_v3  ;;  %235 = vadd.xlane.f32.xlu0 %v234_v4  ;;  %v237_v7 = vsel %vm233_vm0, %v723_v5, 0.0  ;;  %v252_v8 = vmul.f32 %v723_v5, %v723_v5  ;;  %v254_v12 = vmul.f32 %v717_v2, %v717_v2  ;;  %v253_v13 = vmul.f32 %v713_v0, %v713_v0 }
  0x13   : > { %v255_v11 = vsel %vm233_vm0, %v251_v9, 0.0 }
  0x14   : > { %v258_v10 = vsel %vm233_vm0, %v252_v8, 0.0  ;;  %v264_v14 = vsel %vm233_vm0, %v254_v12, 0.0  ;;  %v261_v15 = vsel %vm233_vm0, %v253_v13, 0.0  ;;  %620 = vmatpush3.bf16.msra.mxu1 %v646_v21 }
  0x15   : > { %621 = vmatprep.subr.bf16.mxu1 %v647_v22 }
  0x16   : > { %244 = vadd.xlane.f32.xlu1 %v243_v6  ;;  %238 = vadd.xlane.f32.xlu0 %v237_v7 }
  0x18   : > { %622 = vmatpush3.bf16.msra.mxu1 %v647_v22 }
  0x19   : > { %623 = vmatprep.subr.bf16.mxu1 %v648_v23 }
  0x1a   : > { %259 = vadd.xlane.f32.xlu1 %v258_v10  ;;  %256 = vadd.xlane.f32.xlu0 %v255_v11 }
  0x1c   : > { %624 = vmatpush3.bf16.msra.mxu1 %v648_v23  ;;  %v580_v23 = vld [vmem:[%s795_s4] ss:$0 sm:$0xff] }
  0x1e   : > { %265 = vadd.xlane.f32.xlu1 %v264_v14  ;;  %262 = vadd.xlane.f32.xlu0 %v261_v15 }
  0x9f   : > { %v242_v24 = vpop.xlane.xlu1 %241  ;;  %v236_v25 = vpop.xlane.xlu0 %235 }
  0xa0   : > { %v247_v28 = vmul.f32 0.03125, %v236_v25  ;;  %v249_v30 = vmul.f32 0.03125, %v242_v24 }
  0xa2   : > { %v271_v34 = vmul.f32 %v247_v28, %v247_v28  ;;  %v273_v40 = vmul.f32 %v249_v30, %v249_v30  ;;  %v283_v58 = vsub.f32 %v715_v1, %v247_v28  ;;  %v285_v3 = vsub.f32 %v713_v0, %v249_v30  ;;  %v649_v1 = vld [vmem:[%s794_s3 + $0x30] sm:$0xff]   ;;  %v575_v0 = vld [vmem:[%s793_s2] ss:$0 sm:$0xff] }
  0xa3   : > { %v245_v26 = vpop.xlane.xlu1 %244  ;;  %v239_v27 = vpop.xlane.xlu0 %238  ;;  %625 = vmatprep.subr.bf16.mxu1 %v649_v1 }
  0xa4   : > { %v248_v29 = vmul.f32 0.03125, %v239_v27  ;;  %v250_v31 = vmul.f32 0.03125, %v245_v26  ;;  %626 = vmatpush3.bf16.msra.mxu1 %v649_v1 }
  0xa6   : > { %v272_v35 = vmul.f32 %v248_v29, %v248_v29  ;;  %v274_v41 = vmul.f32 %v250_v31, %v250_v31  ;;  %v284_v56 = vsub.f32 %v723_v5, %v248_v29  ;;  %v286_v62 = vsub.f32 %v717_v2, %v250_v31  ;;  %v650_v2 = vld [vmem:[%s794_s3 + $0x38] sm:$0xff]  }
  0xa7   : > { %v260_v32 = vpop.xlane.xlu1 %259  ;;  %v257_v33 = vpop.xlane.xlu0 %256  ;;  %627 = vmatprep.subr.bf16.mxu1 %v650_v2 }
  0xa8   : > { %v268_v36 = vmul.f32 0.03125, %v260_v32  ;;  %v267_v37 = vmul.f32 0.03125, %v257_v33  ;;  %628 = vmatpush3.bf16.msra.mxu1 %v650_v2 }
  0xaa   : > { %v276_v38 = vsub.f32 %v268_v36, %v272_v35  ;;  %v275_v39 = vsub.f32 %v267_v37, %v271_v34 }
  0xab   : > { %v266_v42 = vpop.xlane.xlu1 %265  ;;  %v263_v43 = vpop.xlane.xlu0 %262 }
  0xac   : > { %v280_v44 = vmax.f32 %v276_v38, 0.0  ;;  %v279_v45 = vmax.f32 %v275_v39, 0.0  ;;  %v270_v46 = vmul.f32 0.03125, %v266_v42  ;;  %v269_v47 = vmul.f32 0.03125, %v263_v43 }
  0xae   : > { %v288_v48 = vadd.f32 1e-05, %v280_v44  ;;  %v287_v49 = vadd.f32 1e-05, %v279_v45  ;;  %v278_v50 = vsub.f32 %v270_v46, %v274_v41  ;;  %v277_v51 = vsub.f32 %v269_v47, %v273_v40 }
  0xb0   : > { %651 = vrsqrt.f32 %v288_v48  ;;  %v282_v52 = vmax.f32 %v278_v50, 0.0  ;;  %v281_v53 = vmax.f32 %v277_v51, 0.0 }
  0xb1   : > { %653 = vrsqrt.f32 %v287_v49 }
  0xb2   : > { %v290_v54 = vadd.f32 1e-05, %v282_v52  ;;  %v289_v55 = vadd.f32 1e-05, %v281_v53 }
  0xb4   : > { %655 = vrsqrt.f32 %v290_v54 }
  0xb5   : > { %657 = vrsqrt.f32 %v289_v55 }
  0xba   : > { %v652_v57 = vpop.eup %651 }
  0xbb   : > { %v654_v59 = vpop.eup %653  ;;  %v296_v60 = vmul.f32 %v652_v57, %v284_v56 }
  0xbc   : > { %v295_v61 = vmul.f32 %v654_v59, %v283_v58 }
  0xbe   : > { %v656_v63 = vpop.eup %655  ;;  %v299_v4 = vpack.c.bf16 %v296_v60, %v295_v61 }
  0xbf   : > { %v658_v6 = vpop.eup %657  ;;  %v298_v7 = vmul.f32 %v656_v63, %v286_v62 }
  0xc0   : > { %609 = vmatprep.mubr.msk.bf16.mxu0 %vm233_vm0, %v299_v4  ;;  %v297_v8 = vmul.f32 %v658_v6, %v285_v3 }
  0xc2   : > { %v300_v9 = vpack.c.bf16 %v298_v7, %v297_v8 }
  0xc4   : > { %610 = vmatmul.mubr.msk.bf16.vlgmr.msra.gmra.mrb[0].mxu0 %vm233_vm0, %v300_v9 }
 0x197   : > { %v611_v5 = vpop.f32.mrb[0].mxu0 }
 0x198   : > { %v373_v10 = vadd.f32 %v611_v5, %v575_v0  ;;  %v364_v11 = vpop.f32.mrb[1].mxu0 }
 0x199   : > { %v365_v12 = vadd.f32 %v575_v0, %v364_v11  ;;  %v612_v13 = vpop.f32.mrb[2].mxu0 }
 0x19a   : > { %v376_v14 = vadd.f32 %v612_v13, %v575_v0  ;;  %v367_v15 = vpop.f32.mrb[3].mxu0  ;;  %v381_v17 = vmax.f32 %v373_v10, 0.0 }
 0x19b   : > { %v368_v16 = vadd.f32 %v575_v0, %v367_v15  ;;  %v379_v19 = vmax.f32 %v365_v12, 0.0 }
 0x19c   : > { %v382_v18 = vmax.f32 %v376_v14, 0.0 }
 0x19d   : > { %v380_v20 = vmax.f32 %v368_v16, 0.0 }
 0x19e   : > { %v384_v21 = vpack.c.bf16 %v382_v18, %v381_v17 }
 0x19f   : > { %v383_v22 = vpack.c.bf16 %v380_v20, %v379_v19 }
 0x1a1   : > { %629 = vmatprep.mubr.bf16.mxu1 %v383_v22 }
 0x1a2   : > { %630 = vmatmul.mubr.bf16.vlgmr.msra.gmra.mrb[0].mxu1 %v384_v21 }
 0x275   : > { %v631_v24 = vpop.f32.mrb[0].mxu1 }
 0x276   : > { %v490_v25 = vpop.f32.mrb[1].mxu1  ;;  %v499_v30 = vadd.f32 %v631_v24, %v580_v23 }
 0x277   : > { %v491_v26 = vadd.f32 %v580_v23, %v490_v25  ;;  %v632_v27 = vpop.f32.mrb[2].mxu1 }
 0x278   : > { %v493_v28 = vpop.f32.mrb[3].mxu1  ;;  %v502_v31 = vadd.f32 %v632_v27, %v580_v23  ;;  %508 = vst.msk [vmem:[%s226_s29 + $0x10] sm:$0xff] %vm505_vm1, %v499_v30 }
 0x279   : > { %506 = vst.msk [vmem:[%s226_s29] sm:$0xff] %vm505_vm1, %v491_v26  ;;  %v494_v29 = vadd.f32 %v580_v23, %v493_v28 }
 0x27a   : > { %509 = vst.msk [vmem:[%s226_s29 + $0x18] sm:$0xff] %vm505_vm1, %v502_v31 }
 0x27b   : > { %507 = vst.msk [vmem:[%s226_s29 + $0x8] sm:$0xff] %vm505_vm1, %v494_v29 }
 0x27c PF: > { %s15_s18 = sadd.s32 1, %s665_s18  }
 0x27d   : > { %p12_p4 = scmp.ge.s32.totalorder %s15_s18, 4  }
 0x27f   :  { %14 = sbr.rel (!%p12_p4) target bundleno = 1 (0x1), region = 70 }

</bundles_post_ra>
